<compile_context>
chip_gen: v7x
topology: tpu7x:2x2x1
jax: 0.10.0
libtpu: 0.0.40
codegen_flags: <defaults>
</compile_context>

<pallas_src>
import functools

import jax
import jax.numpy as jnp
from jax.experimental import pallas as pl
from jax.experimental.pallas import tpu as pltpu

_NEG_BIG = -1e30  # masks padded softmax lanes (exp underflows to exactly 0)


def _round_up(x, m):
    return (x + m - 1) // m * m


def _rnn_lstm_step_kernel(x_ref, h0_ref,
                          wxg_ref, whg_ref, bg_ref,
                          wxo_ref, who_ref, bo_ref,
                          out_ref, h_ref, *, hidden_size):
    """One timestep of RNN_lstm; runs at grid point (batch_block, t).

    x_ref   : (1, Bb, I)    input for this step (streamed per t)
    h0_ref  : (Bb, H)       initial hidden (resident; read only at t == 0)
    wxg_ref : (I, Gp)       [i|g|o] gate weights, input slice (resident)
    whg_ref : (H, Gp)       [i|g|o] gate weights, hidden slice (resident)
    bg_ref  : (1, Gp)       fused gate bias b_ih + b_hh (resident)
    wxo_ref : (I, Op)       i2o weights, input slice, O padded to 128 (resident)
    who_ref : (H, Op)       i2o weights, hidden slice (resident)
    bo_ref  : (1, Op)       i2o bias; padded lanes = -1e30 (resident)
    out_ref : (1, Bb, Op)   per-step log-softmax output (lane-dense store)
    h_ref   : (Bb, H)       hidden state; resident across t, doubles as carry
    """
    t = pl.program_id(1)
    H = hidden_size

    @pl.when(t == 0)
    def _():
        h_ref[...] = h0_ref[...]

    wdt = wxg_ref.dtype                       # matmul input dtype (f32 or bf16)
    x = x_ref[0].astype(wdt)                  # (Bb, I)
    h_prev = h_ref[...]                       # (Bb, H), f32 carry
    h_mm = h_prev.astype(wdt)

    # ---- i2o Linear + LogSoftmax(dim=1); uses the *previous* hidden ----
    logits = (jnp.dot(x, wxo_ref[...], preferred_element_type=jnp.float32)
              + jnp.dot(h_mm, who_ref[...], preferred_element_type=jnp.float32)
              + bo_ref[...])
    m = jnp.max(logits, axis=1, keepdims=True)
    lse = m + jnp.log(jnp.sum(jnp.exp(logits - m), axis=1, keepdims=True))
    out_ref[0] = (logits - lse).astype(out_ref.dtype)

    # ---- LSTMCell gates. The cell is called with no (h, c), so c0 == 0 and
    # the forget gate is dead; only the [i | g | o] columns were kept. ----
    gates = (jnp.dot(x, wxg_ref[...], preferred_element_type=jnp.float32)
             + jnp.dot(h_mm, whg_ref[...], preferred_element_type=jnp.float32)
             + bg_ref[...])
    i_g = jax.nn.sigmoid(gates[:, 0 * H:1 * H])
    g_g = jnp.tanh(gates[:, 1 * H:2 * H])
    o_g = jax.nn.sigmoid(gates[:, 2 * H:3 * H])
    h_ref[...] = (o_g * jnp.tanh(i_g * g_g)).astype(h_ref.dtype)


def prepare_params(params, compute_dtype=jnp.float32):
    """One-time weight preparation (hoisted out of the per-call path).

    Transposes weights to (in_features, out_features), fuses the two LSTM
    biases, drops the dead forget-gate columns (valid only because c0 == 0
    inside the cell), splits the concat dimension into input/hidden slices,
    and pads output feature dims to lane multiples (128).
    `compute_dtype=jnp.bfloat16` halves weight bytes for the MXU on v6e/v7x.
    """
    H = params["b_ih"].shape[0] // 4
    IH = params["w_ih"].shape[1]
    I = IH - H
    O = params["w_o"].shape[0]

    w_ih_t = params["w_ih"].T.astype(jnp.float32)                 # (I+H, 4H)
    b_g4 = (params["b_ih"] + params["b_hh"]).astype(jnp.float32)  # (4H,)

    # keep only i, g, o gate columns (PyTorch chunk order: i, f, g, o)
    cols = [slice(0, H), slice(2 * H, 3 * H), slice(3 * H, 4 * H)]
    w_g = jnp.concatenate([w_ih_t[:, c] for c in cols], axis=1)   # (I+H, 3H)
    b_g = jnp.concatenate([b_g4[c] for c in cols])[None, :]       # (1, 3H)

    Gp = _round_up(3 * H, 128)
    w_g = jnp.pad(w_g, ((0, 0), (0, Gp - 3 * H)))
    b_g = jnp.pad(b_g, ((0, 0), (0, Gp - 3 * H)))

    w_o_t = params["w_o"].T.astype(jnp.float32)                   # (I+H, O)
    Op = _round_up(O, 128)
    w_o_t = jnp.pad(w_o_t, ((0, 0), (0, Op - O)))
    b_o = jnp.pad(params["b_o"].astype(jnp.float32)[None, :],
                  ((0, 0), (0, Op - O)), constant_values=_NEG_BIG)

    cd = compute_dtype
    return {
        "w_x_g": w_g[:I].astype(cd), "w_h_g": w_g[I:].astype(cd), "b_g": b_g,
        "w_x_o": w_o_t[:I].astype(cd), "w_h_o": w_o_t[I:].astype(cd), "b_o": b_o,
        "input_size": I, "hidden_size": H, "output_size": O,
    }


def rnn_lstm_sequence(x_seq, h0, prep, batch_block=None):
    """Run the module's forward over a whole sequence in one pallas_call.

    x_seq: (T, B, I), h0: (B, H).
    Returns (per-step log-softmax outputs (T, B, O), final hidden (B, H)).
    """
    T, B, I = x_seq.shape
    H = h0.shape[1]
    O = prep["output_size"]
    Gp = prep["w_x_g"].shape[1]
    Op = prep["w_x_o"].shape[1]

    Bb = B if batch_block is None else batch_block
    if Bb != B:
        assert B % Bb == 0 and Bb % 8 == 0, "batch block must be sublane-aligned"
    nb = B // Bb

    const = lambda b, t: (0, 0)   # weights/biases: one block, resident in VMEM
    grid_spec = pltpu.PrefetchScalarGridSpec(
        num_scalar_prefetch=0,
        grid=(nb, T),
        in_specs=[
            pl.BlockSpec((1, Bb, I), lambda b, t: (t, b, 0)),    # x_t
            pl.BlockSpec((Bb, H), lambda b, t: (b, 0)),          # h0
            pl.BlockSpec((I, Gp), const),                        # w_x_g
            pl.BlockSpec((H, Gp), const),                        # w_h_g
            pl.BlockSpec((1, Gp), const),                        # b_g
            pl.BlockSpec((I, Op), const),                        # w_x_o
            pl.BlockSpec((H, Op), const),                        # w_h_o
            pl.BlockSpec((1, Op), const),                        # b_o
        ],
        out_specs=(
            pl.BlockSpec((1, Bb, Op), lambda b, t: (t, b, 0)),   # per-step output
            pl.BlockSpec((Bb, H), lambda b, t: (b, 0)),          # hidden carry
        ),
    )

    out_pad, h_final = pl.pallas_call(
        functools.partial(_rnn_lstm_step_kernel, hidden_size=H),
        grid_spec=grid_spec,
        out_shape=(
            jax.ShapeDtypeStruct((T, B, Op), jnp.float32),
            jax.ShapeDtypeStruct((B, H), jnp.float32),
        ),
        compiler_params=pltpu.CompilerParams(
            dimension_semantics=("parallel", "arbitrary"),
            vmem_limit_bytes=32 * 1024 * 1024,
        ),
    )(x_seq, h0, prep["w_x_g"], prep["w_h_g"], prep["b_g"],
      prep["w_x_o"], prep["w_h_o"], prep["b_o"])

    return out_pad[:, :, :O], h_final


def rnn_lstm_forward(input1, hidden, prep):
    """Single-step API matching RNN_lstm.forward(input1, hidden)."""
    out_seq, h_new = rnn_lstm_sequence(input1[None], hidden, prep)
    return out_seq[0], h_new


def init_params(key, input_size, hidden_size, output_size):
    """Deterministic synthetic parameters with PyTorch-like shapes."""
    comb = input_size + hidden_size
    k1, k2, k3, k4, k5 = jax.random.split(key, 5)
    scale_lstm = 1.0 / jnp.sqrt(hidden_size)
    scale_lin = 1.0 / jnp.sqrt(comb)
    return {
        # nn.LSTMCell(comb, hidden): weight_ih (4H, comb), biases (4H,)
        "w_ih": jax.random.uniform(k1, (4 * hidden_size, comb),
                                   minval=-scale_lstm, maxval=scale_lstm),
        "b_ih": jax.random.uniform(k2, (4 * hidden_size,),
                                   minval=-scale_lstm, maxval=scale_lstm),
        "b_hh": jax.random.uniform(k3, (4 * hidden_size,),
                                   minval=-scale_lstm, maxval=scale_lstm),
        # nn.Linear(comb, output_size): weight (O, comb), bias (O,)
        "w_o": jax.random.uniform(k4, (output_size, comb),
                                  minval=-scale_lin, maxval=scale_lin),
        "b_o": jax.random.uniform(k5, (output_size,),
                                  minval=-scale_lin, maxval=scale_lin),
    }


def _reference_step(input1, hidden, params):
    """Pure-JAX reference mirroring the PyTorch module's forward()."""
    combined = jnp.concatenate([input1, hidden], axis=1)
    H = hidden.shape[1]
    gates = combined @ params["w_ih"].T + params["b_ih"] + params["b_hh"]
    i = jax.nn.sigmoid(gates[:, 0 * H:1 * H])
    g = jnp.tanh(gates[:, 2 * H:3 * H])
    o = jax.nn.sigmoid(gates[:, 3 * H:4 * H])
    c = i * g                                       # f * c0 == 0
    h = o * jnp.tanh(c)
    logits = combined @ params["w_o"].T + params["b_o"]
    out = jax.nn.log_softmax(logits, axis=1)
    return out, h


def _reference_sequence(x_seq, h0, params):
    h = h0
    outs = []
    for t in range(x_seq.shape[0]):
        out, h = _reference_step(x_seq[t], h, params)
        outs.append(out)
    return jnp.stack(outs, axis=0), h


if __name__ == "__main__":
    T, B, INPUT, HIDDEN, OUTPUT = 8, 2, 16, 32, 8

    key = jax.random.PRNGKey(0)
    kp, kx = jax.random.split(key, 2)
    params = init_params(kp, INPUT, HIDDEN, OUTPUT)
    prep = prepare_params(params)                   # hoisted, one-time prep
    x_seq = jax.random.normal(kx, (T, B, INPUT), dtype=jnp.float32)
    hidden0 = jnp.zeros((B, HIDDEN), dtype=jnp.float32)   # initHidden()

    # full sequence in one fused pallas_call (weights resident, h carried in VMEM)
    out_seq, h_final = rnn_lstm_sequence(x_seq, hidden0, prep)
    out_seq = jax.block_until_ready(out_seq)
    h_final = jax.block_until_ready(h_final)

    ref_out_seq, ref_h = _reference_sequence(x_seq, hidden0, params)
    assert jnp.allclose(out_seq, ref_out_seq, atol=1e-5, rtol=1e-5)
    assert jnp.allclose(h_final, ref_h, atol=1e-5, rtol=1e-5)

    # single-step API (matches the module's forward signature exactly)
    out1, h1 = rnn_lstm_forward(x_seq[0], hidden0, prep)
    out1 = jax.block_until_ready(out1)
    ref_out1, ref_h1 = _reference_step(x_seq[0], hidden0, params)
    assert jnp.allclose(out1, ref_out1, atol=1e-5, rtol=1e-5)
    assert jnp.allclose(h1, ref_h1, atol=1e-5, rtol=1e-5)

    print("KERNEL_OK")
</pallas_src>

<mosaic_0001>
module attributes {stable_mosaic.version = 11 : i64} {
  func.func @_rnn_lstm_step_kernel(%arg0: i32, %arg1: i32, %arg2: memref<1x2x16xf32, #tpu.memory_space<vmem>>, %arg3: memref<2x32xf32, #tpu.memory_space<vmem>>, %arg4: memref<16x128xf32, #tpu.memory_space<vmem>>, %arg5: memref<32x128xf32, #tpu.memory_space<vmem>>, %arg6: memref<1x128xf32, #tpu.memory_space<vmem>>, %arg7: memref<16x128xf32, #tpu.memory_space<vmem>>, %arg8: memref<32x128xf32, #tpu.memory_space<vmem>>, %arg9: memref<1x128xf32, #tpu.memory_space<vmem>>, %arg10: memref<1x2x128xf32, #tpu.memory_space<vmem>>, %arg11: memref<2x32xf32, #tpu.memory_space<vmem>>) attributes {dimension_semantics = [#tpu.dimension_semantics<parallel>, #tpu.dimension_semantics<arbitrary>], iteration_bounds = array<i64: 1, 8>, scalar_prefetch = 0 : i64, scratch_operands = 0 : i64, tpu.core_type = #tpu.core_type<tc>, window_params = [{transform_indices = @transform_0, window_bounds = array<i64: 1, 2, 16>}, {transform_indices = @transform_1, window_bounds = array<i64: 2, 32>}, {pipeline_mode = #tpu.pipeline_mode<synchronous>, transform_indices = @transform_2, window_bounds = array<i64: 16, 128>}, {pipeline_mode = #tpu.pipeline_mode<synchronous>, transform_indices = @transform_3, window_bounds = array<i64: 32, 128>}, {pipeline_mode = #tpu.pipeline_mode<synchronous>, transform_indices = @transform_4, window_bounds = array<i64: 1, 128>}, {pipeline_mode = #tpu.pipeline_mode<synchronous>, transform_indices = @transform_5, window_bounds = array<i64: 16, 128>}, {pipeline_mode = #tpu.pipeline_mode<synchronous>, transform_indices = @transform_6, window_bounds = array<i64: 32, 128>}, {pipeline_mode = #tpu.pipeline_mode<synchronous>, transform_indices = @transform_7, window_bounds = array<i64: 1, 128>}, {transform_indices = @transform_8, window_bounds = array<i64: 1, 2, 128>}, {transform_indices = @transform_9, window_bounds = array<i64: 2, 32>}]} {
    %c0_i32 = arith.constant 0 : i32
    %0 = arith.cmpi eq, %arg1, %c0_i32 : i32
    %1 = arith.extui %0 : i1 to i32
    %c0_i32_0 = arith.constant 0 : i32
    %2 = arith.cmpi ne, %1, %c0_i32_0 : i32
    scf.if %2 {
      %c0_29 = arith.constant 0 : index
      %c0_30 = arith.constant 0 : index
      %54 = vector.load %arg3[%c0_29, %c0_30] : memref<2x32xf32, #tpu.memory_space<vmem>>, vector<2x32xf32>
      %c0_31 = arith.constant 0 : index
      %c0_32 = arith.constant 0 : index
      %55 = vector.load %arg11[%c0_31, %c0_32] : memref<2x32xf32, #tpu.memory_space<vmem>>, vector<2x32xf32>
      tpu.vector_store %arg11[%c0_31, %c0_32], %54 {strides = array<i32>} : memref<2x32xf32, #tpu.memory_space<vmem>>, vector<2x32xf32>,
    } else {
    }
    %c0 = arith.constant 0 : index
    %c0_1 = arith.constant 0 : index
    %c0_2 = arith.constant 0 : index
    %3 = vector.load %arg2[%c0, %c0_1, %c0_2] : memref<1x2x16xf32, #tpu.memory_space<vmem>>, vector<1x2x16xf32>
    %4 = vector.shape_cast %3 : vector<1x2x16xf32> to vector<2x16xf32>
    %c0_3 = arith.constant 0 : index
    %c0_4 = arith.constant 0 : index
    %5 = vector.load %arg11[%c0_3, %c0_4] : memref<2x32xf32, #tpu.memory_space<vmem>>, vector<2x32xf32>
    %c0_5 = arith.constant 0 : index
    %c0_6 = arith.constant 0 : index
    %6 = vector.load %arg7[%c0_5, %c0_6] : memref<16x128xf32, #tpu.memory_space<vmem>>, vector<16x128xf32>
    %cst = arith.constant dense<0.000000e+00> : vector<2x128xf32>
    %7 = tpu.matmul %4, %6, %cst {dimension_numbers = #tpu.dot_dimension_numbers<[1], [0], [0], [1], [0, 0, 1, 1], [], []>} : vector<2x16xf32>, vector<16x128xf32>, vector<2x128xf32> -> vector<2x128xf32>
    %c0_7 = arith.constant 0 : index
    %c0_8 = arith.constant 0 : index
    %8 = vector.load %arg8[%c0_7, %c0_8] : memref<32x128xf32, #tpu.memory_space<vmem>>, vector<32x128xf32>
    %cst_9 = arith.constant dense<0.000000e+00> : vector<2x128xf32>
    %9 = tpu.matmul %5, %8, %cst_9 {dimension_numbers = #tpu.dot_dimension_numbers<[1], [0], [0], [1], [0, 0, 1, 1], [], []>} : vector<2x32xf32>, vector<32x128xf32>, vector<2x128xf32> -> vector<2x128xf32>
    %10 = arith.addf %7, %9 : vector<2x128xf32>
    %c0_10 = arith.constant 0 : index
    %c0_11 = arith.constant 0 : index
    %11 = vector.load %arg9[%c0_10, %c0_11] : memref<1x128xf32, #tpu.memory_space<vmem>>, vector<1x128xf32>
    %12 = vector.broadcast %11 : vector<1x128xf32> to vector<2x128xf32>
    %13 = arith.addf %10, %12 : vector<2x128xf32>
    %cst_12 = arith.constant dense<0xFF800000> : vector<2xf32>
    %14 = vector.multi_reduction <maximumf>, %13, %cst_12 [1] : vector<2x128xf32> to vector<2xf32>
    %15 = vector.shape_cast %14 : vector<2xf32> to vector<2x1xf32>
    %16 = vector.broadcast %15 : vector<2x1xf32> to vector<2x128xf32>
    %17 = arith.subf %13, %16 : vector<2x128xf32>
    %18 = math.exp %17 : vector<2x128xf32>
    %cst_13 = arith.constant dense<0.000000e+00> : vector<2xf32>
    %19 = vector.multi_reduction <add>, %18, %cst_13 [1] : vector<2x128xf32> to vector<2xf32>
    %20 = vector.shape_cast %19 : vector<2xf32> to vector<2x1xf32>
    %21 = math.log %20 : vector<2x1xf32>
    %22 = arith.addf %15, %21 : vector<2x1xf32>
    %23 = vector.broadcast %22 : vector<2x1xf32> to vector<2x128xf32>
    %24 = arith.subf %13, %23 : vector<2x128xf32>
    %c0_14 = arith.constant 0 : index
    %c0_15 = arith.constant 0 : index
    %c0_16 = arith.constant 0 : index
    %25 = vector.load %arg10[%c0_14, %c0_15, %c0_16] : memref<1x2x128xf32, #tpu.memory_space<vmem>>, vector<1x2x128xf32>
    %26 = vector.shape_cast %25 : vector<1x2x128xf32> to vector<2x128xf32>
    %27 = vector.shape_cast %24 : vector<2x128xf32> to vector<1x2x128xf32>
    tpu.vector_store %arg10[%c0_14, %c0_15, %c0_16], %27 {strides = array<i32>} : memref<1x2x128xf32, #tpu.memory_space<vmem>>, vector<1x2x128xf32>,
    %c0_17 = arith.constant 0 : index
    %c0_18 = arith.constant 0 : index
    %28 = vector.load %arg4[%c0_17, %c0_18] : memref<16x128xf32, #tpu.memory_space<vmem>>, vector<16x128xf32>
    %cst_19 = arith.constant dense<0.000000e+00> : vector<2x128xf32>
    %29 = tpu.matmul %4, %28, %cst_19 {dimension_numbers = #tpu.dot_dimension_numbers<[1], [0], [0], [1], [0, 0, 1, 1], [], []>} : vector<2x16xf32>, vector<16x128xf32>, vector<2x128xf32> -> vector<2x128xf32>
    %c0_20 = arith.constant 0 : index
    %c0_21 = arith.constant 0 : index
    %30 = vector.load %arg5[%c0_20, %c0_21] : memref<32x128xf32, #tpu.memory_space<vmem>>, vector<32x128xf32>
    %cst_22 = arith.constant dense<0.000000e+00> : vector<2x128xf32>
    %31 = tpu.matmul %5, %30, %cst_22 {dimension_numbers = #tpu.dot_dimension_numbers<[1], [0], [0], [1], [0, 0, 1, 1], [], []>} : vector<2x32xf32>, vector<32x128xf32>, vector<2x128xf32> -> vector<2x128xf32>
    %32 = arith.addf %29, %31 : vector<2x128xf32>
    %c0_23 = arith.constant 0 : index
    %c0_24 = arith.constant 0 : index
    %33 = vector.load %arg6[%c0_23, %c0_24] : memref<1x128xf32, #tpu.memory_space<vmem>>, vector<1x128xf32>
    %34 = vector.broadcast %33 : vector<1x128xf32> to vector<2x128xf32>
    %35 = arith.addf %32, %34 : vector<2x128xf32>
    %36 = vector.extract_strided_slice %35 {offsets = [0, 0], sizes = [2, 32], strides = [1, 1]} : vector<2x128xf32> to vector<2x32xf32>
    %37 = arith.negf %36 : vector<2x32xf32>
    %38 = math.exp %37 : vector<2x32xf32>
    %cst_25 = arith.constant 1.000000e+00 : f32
    %39 = vector.broadcast %cst_25 : f32 to vector<2x32xf32>
    %40 = arith.addf %39, %38 : vector<2x32xf32>
    %41 = arith.divf %39, %40 : vector<2x32xf32>
    %42 = vector.extract_strided_slice %35 {offsets = [0, 32], sizes = [2, 32], strides = [1, 1]} : vector<2x128xf32> to vector<2x32xf32>
    %43 = math.tanh %42 : vector<2x32xf32>
    %44 = vector.extract_strided_slice %35 {offsets = [0, 64], sizes = [2, 32], strides = [1, 1]} : vector<2x128xf32> to vector<2x32xf32>
    %45 = arith.negf %44 : vector<2x32xf32>
    %46 = math.exp %45 : vector<2x32xf32>
    %cst_26 = arith.constant 1.000000e+00 : f32
    %47 = vector.broadcast %cst_26 : f32 to vector<2x32xf32>
    %48 = arith.addf %47, %46 : vector<2x32xf32>
    %49 = arith.divf %47, %48 : vector<2x32xf32>
    %50 = arith.mulf %41, %43 : vector<2x32xf32>
    %51 = math.tanh %50 : vector<2x32xf32>
    %52 = arith.mulf %49, %51 : vector<2x32xf32>
    %c0_27 = arith.constant 0 : index
    %c0_28 = arith.constant 0 : index
    %53 = vector.load %arg11[%c0_27, %c0_28] : memref<2x32xf32, #tpu.memory_space<vmem>>, vector<2x32xf32>
    tpu.vector_store %arg11[%c0_27, %c0_28], %52 {strides = array<i32>} : memref<2x32xf32, #tpu.memory_space<vmem>>, vector<2x32xf32>,
    return
  }
  func.func @transform_0(%arg0: i32, %arg1: i32) -> (i32, i32, i32) {
    %c0_i32 = arith.constant 0 : i32
    %c0_i32_0 = arith.constant 0 : i32
    return %arg1, %arg0, %c0_i32 : i32, i32, i32
  }
  func.func @transform_1(%arg0: i32, %arg1: i32) -> (i32, i32) {
    %c0_i32 = arith.constant 0 : i32
    %c0_i32_0 = arith.constant 0 : i32
    return %arg0, %c0_i32 : i32, i32
  }
  func.func @transform_2(%arg0: i32, %arg1: i32) -> (i32, i32) {
    %c0_i32 = arith.constant 0 : i32
    %c0_i32_0 = arith.constant 0 : i32
    %c0_i32_1 = arith.constant 0 : i32
    return %c0_i32, %c0_i32_0 : i32, i32
  }
  func.func @transform_3(%arg0: i32, %arg1: i32) -> (i32, i32) {
    %c0_i32 = arith.constant 0 : i32
    %c0_i32_0 = arith.constant 0 : i32
    %c0_i32_1 = arith.constant 0 : i32
    return %c0_i32, %c0_i32_0 : i32, i32
  }
  func.func @transform_4(%arg0: i32, %arg1: i32) -> (i32, i32) {
    %c0_i32 = arith.constant 0 : i32
    %c0_i32_0 = arith.constant 0 : i32
    %c0_i32_1 = arith.constant 0 : i32
    return %c0_i32, %c0_i32_0 : i32, i32
  }
  func.func @transform_5(%arg0: i32, %arg1: i32) -> (i32, i32) {
    %c0_i32 = arith.constant 0 : i32
    %c0_i32_0 = arith.constant 0 : i32
    %c0_i32_1 = arith.constant 0 : i32
    return %c0_i32, %c0_i32_0 : i32, i32
  }
  func.func @transform_6(%arg0: i32, %arg1: i32) -> (i32, i32) {
    %c0_i32 = arith.constant 0 : i32
    %c0_i32_0 = arith.constant 0 : i32
    %c0_i32_1 = arith.constant 0 : i32
    return %c0_i32, %c0_i32_0 : i32, i32
  }
  func.func @transform_7(%arg0: i32, %arg1: i32) -> (i32, i32) {
    %c0_i32 = arith.constant 0 : i32
    %c0_i32_0 = arith.constant 0 : i32
    %c0_i32_1 = arith.constant 0 : i32
    return %c0_i32, %c0_i32_0 : i32, i32
  }
  func.func @transform_8(%arg0: i32, %arg1: i32) -> (i32, i32, i32) {
    %c0_i32 = arith.constant 0 : i32
    %c0_i32_0 = arith.constant 0 : i32
    return %arg1, %arg0, %c0_i32 : i32, i32, i32
  }
  func.func @transform_9(%arg0: i32, %arg1: i32) -> (i32, i32) {
    %c0_i32 = arith.constant 0 : i32
    %c0_i32_0 = arith.constant 0 : i32
    return %arg0, %c0_i32 : i32, i32
  }
}

</mosaic_0001>

<bundles_post_ra>
// kernel: tpu_custom_call.1
= control target key start
LH: loop header
LB: loop body
LE: loop exit
PB: predicated region body
PF: predicated region fallthrough
CT: control target
= control target key end

     0   :  { %s1898_s0 = inlined_call_operand.hbm [shape: f32[8,2,16], index: 0, kind: input, shape index: {}]   ;;  %s1899_s1 = inlined_call_operand.vmem [shape: f32[2,32], index: 1, kind: input, shape index: {}]   ;;  %s1900_s2 = inlined_call_operand.hbm [shape: f32[16,128], index: 2, kind: input, shape index: {}]   ;;  %s1901_s3 = inlined_call_operand.hbm [shape: f32[32,128], index: 3, kind: input, shape index: {}]   ;;  %s1902_s4 = inlined_call_operand.hbm [shape: f32[1,128], index: 4, kind: input, shape index: {}]   ;;  %s1903_s5 = inlined_call_operand.vmem [shape: f32[16,128], index: 5, kind: input, shape index: {}]   ;;  %s1904_s6 = inlined_call_operand.hbm [shape: f32[32,128], index: 6, kind: input, shape index: {}]   ;;  %s1905_s7 = inlined_call_operand.vmem [shape: f32[1,128], index: 7, kind: input, shape index: {}]   ;;  %s1906_s8 = inlined_call_operand.hbm [shape: f32[8,2,128], index: 8, kind: output, shape index: {0}]   ;;  %s1907_s9 = inlined_call_operand.hbm [shape: f32[2,32], index: 9, kind: output, shape index: {1}]  }
   0x1   :  { %1917 = sst [smem:[#allocation19_spill]] %s1900_s2 }
   0x2   :  { %1918 = sst [smem:[#allocation20_spill]] %s1901_s3 }
   0x3   :  { %1919 = sst [smem:[#allocation21_spill]] %s1905_s7 }
   0x4   :  { %1920 = sst [smem:[#allocation22_spill]] %s1906_s8 }
   0x5   :  { %1921 = sst [smem:[#allocation23_spill]] %s1907_s9 }
   0x6   :  { %15 = vsyncpa [#allocation3], 0 }
   0x7   :  { %17 = vsyncpa [#allocation3 + $0x1], 0 }
   0x8   :  { %18 = vsyncpa [#allocation6], 0 }
   0x9   :  { %19 = vsyncpa [#allocation9], 0 }
   0xa   :  { %20 = vsyncpa [#allocation4], 0 }
   0xb   :  { %22 = vsyncpa [#allocation4 + $0x1], 0 }
   0xc   :  { %23 = vsyncpa [#allocation13], 0  ;;  %s1539_s30 = smov 0   ;;  %s1541_s10 = smov 0  }
   0xd   :  { %s1543_s11 = smov 0   ;;  %s1545_s12 = smov 0  }
   0xe   :  { %s1547_s13 = smov 0   ;;  %s1549_s14 = smov 0  }
   0xf LB: > { %s1908_s15 = sadd.s32 4294967295, %s1473_s14   ;;  %p982_p0 = scmp.ge.s32.totalorder %s1473_s14, 1  ;;  %s1473_s14 = sphi %s1549_s14, %s29_s14   ;;  %s1469_s13 = sphi %s1547_s13, %s1948_s13   ;;  %s1465_s12 = sphi %s1545_s12, %s1947_s12   ;;  %s1461_s11 = sphi %s1543_s11, %s1946_s11   ;;  %s1457_s10 = sphi %s1541_s10, %s1945_s10   ;;  %s1453_s30 = sphi %s1539_s30, %s1944_s30  }
  0x10   : > { %p1573_p1 = scmp.eq.s32.totalorder %s1908_s15, 0  ;;  %p280_p2 = scmp.lt.s32.totalorder %s1473_s14, 9 }
  0x11   : > { %s1475_s18 = smov [#allocation5]   ;;  %s1476_s21 = smov [#allocation8]  }
  0x12   : > { %s1922_s16 = scalar_select %p1573_p1, 1, 0 }
  0x13   : > { %p1578_p3 = pnand %p982_p0, %p280_p2  ;;  %s299_s19 = sshll.u32 %s1475_s18, 4  ;;  %s1582_s19 = int_to_ptr.vmem [resolvable:$true] %s299_s19 }
  0x14   : > { %s326_s22 = sshll.u32 %s1476_s21, 4  ;;  %s1477_s23 = smov [#allocation7]   ;;  %s1592_s22 = int_to_ptr.vmem [resolvable:$true] %s326_s22 }
  0x15   : > { %s1923_s17 = scalar_select %p1578_p3, 1, 0 }
  0x16   : > { %p1106_p4 = pneg %p1578_p3  ;;  %s1594_s24 = sshll.u32 %s1477_s23, 4  ;;  %s313_s24 = int_to_ptr.vmem [resolvable:$true] %s1594_s24 }
  0x17   : > { %s1925_s2 = sld [smem:[#allocation19_spill]] }
  0x18   : > { %p1588_p5 = pnand %p1106_p4, %p1573_p1 }
  0x1a   : > { %p1604_p7 = pneg %p1588_p5 }
  0x1d   : > { %s1211_s27 = scalar_lea.hbm %s1925_s2, 256 }
  0x1e   : > { %p1212_p6 = scmp.ne.s32.totalorder %s1925_s2, %s1211_s27  ;;  %p1218_p10 = scmp.lt.u32.totalorder %s1211_s27, %s1925_s2 }
  0x20   : > { %p1214_p8 = pnand %p1604_p7, %p1212_p6 }
  0x22   : > { %p1215_p9 = pneg %p1214_p8 }
  0x24   : > { %p1220_p11 = pnand %p1218_p10, %p1215_p9 }
  0x26   : > { %1223 = shalt.err (!%p1220_p11)
}
  0x27   : > { %s1224_s25 = scalar_lea.vmem %s1582_s19, 256  ;;  %p1232_p2 = scmp.lt.s32.totalorder %s1582_s19, %s1582_s19 }
  0x28   : > { %p1225_p12 = scmp.ne.s32.totalorder %s1582_s19, %s1224_s25  ;;  %p1233_p4 = scmp.lt.s32.totalorder %s1224_s25, %s1224_s25 }
  0x2a   : > { %p1227_p13 = pnand %p1225_p12, %p1604_p7  ;;  %p1234_p6 = por %p1233_p4, %p1232_p2 }
  0x2c   : > { %p1228_p0 = pneg %p1227_p13 }
  0x2e   : > { %p1235_p8 = pnand %p1234_p6, %p1228_p0 }
  0x30   : > { %1238 = shalt.err (!%p1235_p8)
}
  0x31   : > { %s1478_s26 = smov 128   ;;  %s1479_s27 = smov 8  }
  0x32   : > { %1109 = dma.hbm_to_vmem [thread:$0]  (!%p1588_p5), %s1925_s2, 256, %s1582_s19, [#allocation6], %s1478_s26, %s1478_s26, %s1479_s27  }
  0x33   : > { %s1239_s25 = scalar_lea.hbm %s1902_s4, 16 }
  0x34   : > { %p1240_p9 = scmp.ne.s32.totalorder %s1902_s4, %s1239_s25  ;;  %p1246_p12 = scmp.lt.u32.totalorder %s1239_s25, %s1902_s4 }
  0x36   : > { %p1242_p10 = pnand %p1240_p9, %p1604_p7 }
  0x38   : > { %p1243_p11 = pneg %p1242_p10 }
  0x3a   : > { %p1248_p13 = pnand %p1246_p12, %p1243_p11 }
  0x3c   : > { %1251 = shalt.err (!%p1248_p13)
}
  0x3d   : > { %s1252_s19 = scalar_lea.vmem %s1592_s22, 16  ;;  %s1259_s9 = scalar_lea.vmem %s1592_s22, 32 }
  0x3e   : > { %p1253_p0 = scmp.ne.s32.totalorder %s1592_s22, %s1252_s19  ;;  %p1260_p6 = scmp.lt.s32.totalorder %s1592_s22, %s1592_s22 }
  0x3f   : > { %p1261_p8 = scmp.lt.s32.totalorder %s1259_s9, %s1252_s19 }
  0x40   : > { %p1255_p2 = pnand %p1253_p0, %p1604_p7 }
  0x41   : > { %p1262_p9 = por %p1261_p8, %p1260_p6 }
  0x42   : > { %p1256_p4 = pneg %p1255_p2 }
  0x44   : > { %p1263_p10 = pnand %p1262_p9, %p1256_p4 }
  0x46   : > { %1266 = shalt.err (!%p1263_p10)
}
  0x47   : > { %1115 = dma.hbm_to_vmem [thread:$0]  (!%p1588_p5), %s1902_s4, 16, %s1592_s22, [#allocation9]  }
  0x48   : > { %s1927_s3 = sld [smem:[#allocation20_spill]] }
  0x4e   : > { %s1267_s29 = scalar_lea.hbm %s1927_s3, 512 }
  0x4f   : > { %p1268_p11 = scmp.ne.s32.totalorder %s1927_s3, %s1267_s29  ;;  %p1274_p0 = scmp.lt.u32.totalorder %s1267_s29, %s1927_s3 }
  0x51   : > { %p1270_p12 = pnand %p1268_p11, %p1604_p7 }
  0x53   : > { %p1271_p13 = pneg %p1270_p12 }
  0x55   : > { %p1276_p2 = pnand %p1274_p0, %p1271_p13 }
  0x57   : > { %1279 = shalt.err (!%p1276_p2)
}
  0x58   : > { %s1280_s9 = scalar_lea.vmem %s313_s24, 512  ;;  %p1288_p9 = scmp.lt.s32.totalorder %s313_s24, %s313_s24 }
  0x59   : > { %p1281_p4 = scmp.ne.s32.totalorder %s313_s24, %s1280_s9  ;;  %p1289_p10 = scmp.lt.s32.totalorder %s1280_s9, %s1280_s9 }
  0x5b   : > { %p1283_p6 = pnand %p1281_p4, %p1604_p7  ;;  %p1290_p3 = por %p1289_p10, %p1288_p9 }
  0x5d   : > { %p1284_p8 = pneg %p1283_p6 }
  0x5f   : > { %p1291_p1 = pnand %p1290_p3, %p1284_p8 }
  0x61   : > { %1294 = shalt.err (!%p1291_p1)
}
  0x62   : > { %1112 = dma.hbm_to_vmem [thread:$0]  (!%p1588_p5), %s1927_s3, 512, %s313_s24, [#allocation6], %s1478_s26, %s1478_s26, %s1479_s27  }
  0x63   : > { %s1480_s8 = smov [#allocation10]   ;;  %s1295_s21 = scalar_lea.hbm %s1904_s6, 512 }
  0x64   : > { %s339_s15 = sshll.u32 %s1480_s8, 4  ;;  %p1296_p1 = scmp.ne.s32.totalorder %s1904_s6, %s1295_s21  ;;  %s340_s15 = int_to_ptr.vmem [resolvable:$true] %s339_s15 }
  0x65   : > { %p1302_p12 = scmp.lt.u32.totalorder %s1295_s21, %s1904_s6 }
  0x66   : > { %p1298_p3 = pnand %p1296_p1, %p1604_p7 }
  0x68   : > { %p1299_p11 = pneg %p1298_p3 }
  0x6a   : > { %p1304_p13 = pnand %p1302_p12, %p1299_p11 }
  0x6c   : > { %1307 = shalt.err (!%p1304_p13)
}
  0x6d   : > { %s1308_s24 = scalar_lea.vmem %s340_s15, 512  ;;  %p1316_p6 = scmp.lt.s32.totalorder %s340_s15, %s340_s15 }
  0x6e   : > { %p1309_p0 = scmp.ne.s32.totalorder %s340_s15, %s1308_s24  ;;  %p1317_p8 = scmp.lt.s32.totalorder %s1308_s24, %s1308_s24 }
  0x70   : > { %p1311_p2 = pnand %p1309_p0, %p1604_p7  ;;  %p1318_p9 = por %p1317_p8, %p1316_p6 }
  0x72   : > { %p1312_p4 = pneg %p1311_p2 }
  0x74   : > { %p1319_p10 = pnand %p1318_p9, %p1312_p4 }
  0x76   : > { %1322 = shalt.err (!%p1319_p10)
}
  0x77   : > { %1118 = dma.hbm_to_vmem [thread:$0]  (!%p1588_p5), %s1904_s6, 512, %s340_s15, [#allocation9], %s1478_s26, %s1478_s26, %s1479_s27  }
  0x78   : > { %s981_s20 = sadd.s32 4294967294, %s1473_s14   ;;  %s38_s18 = sadd.s32 1, %s1469_s13 }
  0x79   : > { %p39_p7 = scmp.ge.s32.totalorder %s38_s18, 8  ;;  %s50_s8 = sadd.s32 1, %s1461_s11 }
  0x7a   : > { %p57_p1 = scmp.ne.s32.totalorder %s1461_s11, %s1457_s10  ;;  %p58_p3 = scmp.eq.s32.totalorder %s1473_s14, 0 }
  0x7b   : > { %s1950_s18 = smov (%p39_p7, %s38_s18), 0  ;;  %p63_p12 = scmp.ne.s32.totalorder %s1457_s10, %s1453_s30 }
  0x7c   : > { %p1703_p11 = por %p58_p3, %p57_p1  ;;  %s45_s26 = ssub.s32 %s1469_s13, %s1950_s18 }
  0x7d   : > { %s1929_s27 = sadd.s32 4294967295, %s1473_s14   ;;  %p48_p13 = scmp.eq.s32.totalorder %s45_s26, 0 }
  0x7e   : > { %p1713_p5 = scmp.eq.s32.totalorder %s1929_s27, 7  ;;  %p1931_p0 = scmp.ne.s32.totalorder %s1922_s16, 0 }
  0x7f   : > { %p247_p6 = scmp.eq.s32.totalorder %s981_s20, 7  ;;  %p1131_p9 = scmp.lt.s32.totalorder %s1473_s14, 8 }
  0x80   : > { %s1930_s15 = scalar_select %p1713_p5, 1, 0 }
  0x81   : > { %p1719_p2 = por %p1931_p0, %p63_p12  ;;  %p1725_p4 = por %p1713_p5, %p57_p1 }
  0x82   : > { %s1730_s23 = scalar_select %p48_p13, %s1461_s11, %s50_s8  }
  0x83   : > { %s1933_s21 = scalar_select %p1725_p4, 1, 0 }
  0x84   : > { %p1732_p8 = por %p247_p6, %p63_p12  ;;  %s356_s19 = sand.u32 1, %s1461_s11  }
  0x85   : > { %s990_s9 = sshll.u32 %s1469_s13, 5  ;;  %s989_s24 = sshll.u32 %s356_s19, 1 }
  0x86   : > { %s1934_s25 = scalar_select %p1732_p8, 1, 0 }
  0x87   : > { %s1742_s26 = scalar_lea.hbm %s1898_s0, %s990_s9  ;;  %s360_s20 = scalar_lea.vmem [#allocation2], %s989_s24 }
  0x88   : > { %s368_s8 = sshll.u32 %s360_s20, 4  ;;  %p1746_p10 = pnand %p1131_p9, %p1703_p11  ;;  %s1750_s8 = int_to_ptr.vmem [resolvable:$true] %s368_s8 }
  0x89   : > { %s357_s2 = scalar_lea.sflag [#allocation3], %s356_s19  ;;  %s1323_s3 = scalar_lea.hbm %s1742_s26, 32 }
  0x8a   : > { %p1324_p7 = scmp.ne.s32.totalorder %s1742_s26, %s1323_s3  ;;  %p1325_p1 = pneg %p1746_p10 }
  0x8b   : > { %s1328_s28 = scalar_lea.hbm %s1898_s0, 256  ;;  %p1329_p11 = scmp.lt.u32.totalorder %s1742_s26, %s1898_s0 }
  0x8c   : > { %p1326_p3 = pnand %p1325_p1, %p1324_p7  ;;  %p1330_p13 = scmp.lt.u32.totalorder %s1328_s28, %s1323_s3 }
  0x8d   : > { %p1332_p6 = scmp.lt.u32.totalorder %s1323_s3, %s1742_s26 }
  0x8e   : > { %p1327_p12 = pneg %p1326_p3  ;;  %p1331_p0 = por %p1330_p13, %p1329_p11 }
  0x90   : > { %p1333_p9 = por %p1332_p6, %p1331_p0 }
  0x92   : > { %p1334_p8 = pnand %p1333_p9, %p1327_p12 }
  0x94   : > { %1337 = shalt.err (!%p1334_p8)
}
  0x95   : > { %s1338_s19 = scalar_lea.vmem %s1750_s8, 32  ;;  %s1481_s20 = smov [#allocation2]  }
  0x96   : > { %p1339_p7 = scmp.ne.s32.totalorder %s1750_s8, %s1338_s19  ;;  %s1343_s9 = sshll.u32 %s1481_s20, 4  ;;  %s1344_s9 = int_to_ptr.vmem [resolvable:$false] %s1343_s9 }
  0x97   : > { %s1345_s24 = scalar_lea.vmem %s1344_s9, 64  ;;  %p1346_p4 = scmp.lt.s32.totalorder %s1750_s8, %s1344_s9 }
  0x98   : > { %p1341_p3 = pnand %p1339_p7, %p1325_p1  ;;  %p1347_p11 = scmp.lt.s32.totalorder %s1345_s24, %s1338_s19 }
  0x9a   : > { %p1342_p5 = pneg %p1341_p3  ;;  %p1348_p13 = por %p1347_p11, %p1346_p4 }
  0x9c   : > { %p1349_p0 = pnand %p1348_p13, %p1342_p5 }
  0x9e   : > { %1352 = shalt.err (!%p1349_p0)
}
  0x9f   : > { %1122 = dma.hbm_to_vmem [thread:$0]  (!%p1746_p10), %s1742_s26, 32, %s1750_s8, %s357_s2  }
  0xa0   : > { %p1936_p8 = scmp.ne.s32.totalorder %s1923_s17, 0 }
  0xa1   : > { %s1780_s3 = sand.u32 (!%p1936_p8), 1, %s1457_s10  }
  0xa2   : > { %377 = sbr.rel (%p1936_p8) target bundleno = 819 (0x333), region = 52  ;;  %s992_s28 = sshll.u32 (!%p1936_p8), %s1780_s3, 1 }
  0xa3   : > { %s380_s22 = scalar_lea.sflag (!%p1936_p8), [#allocation3], %s1780_s3  ;;  %s1784_s7 = scalar_lea.vmem (!%p1936_p8), [#allocation2], %s992_s28 }
  0xa9   : > { %1432 = dma.done.wait (%p1719_p2), %s380_s22, 32  }
  0xaa   : > { %1434 = vsyncadd (%p1719_p2), %s380_s22, 4294967264  ;;  %p1937_p5 = scmp.ne.s32.totalorder %s1922_s16, 0 }
  0xac   : > { %1436 = dma.done.wait (%p1937_p5), [#allocation6], 768  }
  0xad   : > { %1438 = vsyncadd (%p1937_p5), [#allocation6], 4294966528 }
  0xae   : > { %1440 = dma.done.wait (%p1937_p5), [#allocation9], 528  }
  0xaf   : > { %1442 = vsyncadd (%p1937_p5), [#allocation9], 4294966768  ;;  %s1798_s2 = scalar_lea.vmem [#allocation11], %s992_s28  ;;  %p998_p4 = scmp.ne.s32.totalorder %s1465_s12, 0 }
  0xb0   : > { %v446_v0 = vld [vmem:[%s1899_s1] sm:$0x3] (!%p998_p4)  ;;  %vm447_vm0 = vcmask (!%p998_p4), 254976  }
  0xb1   : > { %445 = sbr.rel (%p998_p4) target bundleno = 184 (0xb8), region = 76  ;;  %448 = vst.msk [vmem:[#allocation12] sm:$0x3] (!%p998_p4), %vm447_vm0, %v446_v0 }
  0xb8 PF: > { %v453_v1 = vld [vmem:[#allocation10] sm:$0xff]  ;;  %v454_v2 = vld [vmem:[#allocation10 + $0x8] sm:$0xff]  ;;  %v1482_v4 = vmov 0.0|0.0   ;;  %v452_v6 = vld [vmem:[%s1903_s5 + $0x8] sm:$0xff]  ;;  %vm1483_vm1 = vmmov 0   ;;  %v1484_v10 = vmov 0.0  }
  0xb9   : > { %v451_v3 = vld [vmem:[%s1903_s5] sm:$0xff]  ;;  %1064 = vmatprep.subr.bf16.mxu0 %v1482_v4  ;;  %1070 = vmatprep.subr.bf16.mxu1 %v1482_v4  ;;  %v1065_v5 = vpack.c.bf16 %v454_v2, %v453_v1  ;;  %v456_v8 = vld [vmem:[#allocation10 + $0x18] sm:$0xff]  ;;  %vm531_vm2 = vcmask 130048   ;;  %v450_v20 = vld [vmem:[#allocation12] sm:$0x3]  ;;  %vm457_vm3 = vcmask 261120  }
  0xba   : > { %v455_v7 = vld [vmem:[#allocation10 + $0x10] sm:$0xff]  ;;  %v1071_v9 = vpack.c.bf16 %v452_v6, %v451_v3  ;;  %1043 = vmatprep.mubr.msk.f32.mxu1 %vm1483_vm1, %v1484_v10  ;;  %v630_v11 = vld [vmem:[#allocation7] sm:$0xff]  ;;  %v631_v12 = vld [vmem:[#allocation7 + $0x8] sm:$0xff]  ;;  %1036 = vmatprep.mubr.msk.f32.mxu0 %vm1483_vm1, %v1484_v10  ;;  %s1485_s19 = smov 96   ;;  %s1938_s24 = sld [smem:[#allocation21_spill]]  ;;  %vm613_vm4 = vcmask 1041408  }
  0xbb   : > { %1066 = vmatpush3.bf16.msra.mxu0 %v1065_v5  ;;  %v1068_v13 = vpack.c.bf16 %v456_v8, %v455_v7  ;;  %v449_v14 = vld [vmem:[%s1784_s7] sm:$0x3]  ;;  %v1074_v15 = vpack.c.bf16 %v631_v12, %v630_v11  ;;  %v628_v16 = vld [vmem:[#allocation5] sm:$0xff]  ;;  %v629_v17 = vld [vmem:[#allocation5 + $0x8] sm:$0xff]  ;;  %s1486_s28 = smov 64   ;;  %s1007_s22 = sshll.u32 %s1465_s12, 5 }
  0xbc   : > { %1072 = vmatpush3.bf16.msra.mxu1 %v1071_v9  ;;  %1067 = vmatprep.subr.bf16.mxu0 %v1482_v4  ;;  %v632_v18 = vld [vmem:[#allocation7 + $0x10] sm:$0xff]  ;;  %v633_v19 = vld [vmem:[#allocation7 + $0x18] sm:$0xff]  ;;  %v1080_v21 = vpack.c.bf16 %v629_v17, %v628_v16  ;;  %v1004_v30 = vld [vmem:[#allocation8] ss:$0 sm:$0xff]  ;;  %s821_s7 = sshll.u32 %s1798_s2, 4  ;;  %s1939_s26 = sld [smem:[#allocation22_spill]]  ;;  %s1829_s7 = int_to_ptr.vmem [resolvable:$true] %s821_s7 }
  0xbd   : > { %1073 = vmatprep.subr.bf16.mxu1 %v1482_v4  ;;  %v1077_v22 = vpack.c.bf16 %v633_v19, %v632_v18  ;;  %s807_s16 = scalar_lea.sflag [#allocation4], %s1780_s3  ;;  %s1353_s27 = scalar_lea.vmem %s1829_s7, 32 }
  0xbe   : > { %p1354_p2 = scmp.ne.s32.totalorder %s1829_s7, %s1353_s27  ;;  %p1940_p10 = scmp.ne.s32.totalorder %s1933_s21, 0 }
  0xbf   : > { %1069 = vmatpush3.bf16.msra.mxu0 %v1068_v13  ;;  %1044 = vmatmul.mubr.msk.f32.vlgmr.msra.gmra.mrb[0].mxu1 %vm531_vm2, %v449_v14  ;;  %s1487_s12 = smov [#allocation11]  }
  0xc0   : > { %1075 = vmatpush3.bf16.msra.mxu1 %v1074_v15  ;;  %1079 = vmatprep.subr.bf16.mxu0 %v1482_v4  ;;  %v1001_v36 = vld [vmem:[%s1938_s24] ss:$0 sm:$0xff]  ;;  %p1355_p1 = pnand %p1354_p2, %p1940_p10 }
  0xc1   : > { %1076 = vmatprep.subr.bf16.mxu1 %v1482_v4  ;;  %1054 = vmatprep.mubr.msk.f32.mxu1 %vm1483_vm1, %v1484_v10 }
  0xc2   : > { %1037 = vmatmul.mubr.msk.f32.vlgmr.msra.gmra.mrb[0].mxu0 %vm457_vm3, %v450_v20  ;;  %s1827_s8 = scalar_lea.hbm %s1939_s26, %s1007_s22  ;;  %p1356_p12 = pneg %p1355_p1 }
  0xc3   : > { %1081 = vmatpush3.bf16.msra.mxu0 %v1080_v21  ;;  %1061 = vmatprep.mubr.msk.f32.mxu0 %vm1483_vm1, %v1484_v10 }
  0xc4   : > { %1078 = vmatpush3.bf16.msra.mxu1 %v1077_v22 }
  0xc6   : > { %1062 = vmatmul.mubr.msk.f32.vlgmr.msra.gmra.mrb[2].mxu0 %vm531_vm2, %v449_v14 }
  0xc7   : > { %1055 = vmatmul.mubr.msk.f32.vlgmr.msra.gmra.mrb[2].mxu1 %vm457_vm3, %v450_v20 }
 0x192   : > { %v601_v23 = vpop.f32.mrb[0].mxu1 }
 0x193   : > { %v1045_v24 = vpop.f32.mrb[1].mxu1 }
 0x195   : > { %v527_v25 = vpop.f32.mrb[0].mxu0 }
 0x196   : > { %v602_v26 = vadd.f32 %v601_v23, %v527_v25  ;;  %v1038_v27 = vpop.f32.mrb[1].mxu0 }
 0x198   : > { %v612_v37 = vadd.f32 %v1001_v36, %v602_v26 }
 0x199   : > { %v770_v28 = vpop.f32.mrb[2].mxu0 }
 0x19a   : > { %v700_v29 = vpop.f32.mrb[2].mxu1  ;;  %v1063_v31 = vpop.f32.mrb[3].mxu0  ;;  %v614_v38 = vsel %vm613_vm4, %v612_v37, -inf }
 0x19b   : > { %v771_v32 = vadd.f32 %v770_v28, %v700_v29  ;;  %v1056_v33 = vpop.f32.mrb[3].mxu1 }
 0x19d   : > { %v781_v34 = vadd.f32 %v1004_v30, %v771_v32 }
 0x19f   : > { %1199 = vtanh.f32 %v781_v34  ;;  %v1005_v39 = vmul.f32 -1.442695, %v781_v34 }
 0x1a1   : > { %1201 = vpow2.f32 %v1005_v39 }
 0x1a9   : > { %v1200_v35 = vpop.eup %1199 }
 0x1aa   : > { %790 = vrot.lane.b32.xlu0 %v1200_v35, %s1485_s19  ;;  %s1357_s19 = sshll.u32 %s1487_s12, 4  ;;  %s1358_s19 = int_to_ptr.vmem [resolvable:$false] %s1357_s19 }
 0x1ab   : > { %v1202_v40 = vpop.eup %1201  ;;  %s1359_s20 = scalar_lea.vmem %s1358_s19, 64  ;;  %p1360_p6 = scmp.lt.s32.totalorder %s1829_s7, %s1358_s19 }
 0x1ac   : > { %v785_v41 = vadd.f32 1.0, %v1202_v40  ;;  %p1361_p9 = scmp.lt.s32.totalorder %s1359_s20, %s1353_s27 }
 0x1ae   : > { %1203 = vrcp.f32 %v785_v41  ;;  %p1362_p7 = por %p1361_p9, %p1360_p6 }
 0x1b0   : > { %p1363_p3 = pnand %p1362_p7, %p1356_p12 }
 0x1b8   : > { %v1204_v42 = vpop.eup %1203 }
 0x1c9   : > { %615 = vmax.xlane.f32.xlu0 %v614_v38 }
 0x21c   : > { %v791_v43 = vpop.permute.xlu0 %790 }
 0x21d   : > { %v793_v44 = vmul.f32 %v1204_v42, %v791_v43 }
 0x21f   : > { %1205 = vtanh.f32 %v793_v44 }
 0x229   : > { %v1206_v45 = vpop.eup %1205 }
 0x22a   : > { %796 = vrot.lane.b32.xlu1 %v1206_v45, %s1486_s28 }
 0x256   : > { %v616_v46 = vpop.xlane.xlu0 %615 }
 0x257   : > { %v617_v47 = vsub.f32 %v612_v37, %v616_v46 }
 0x259   : > { %v618_v48 = vmul.f32 1.442695, %v617_v47 }
 0x25b   : > { %1207 = vpow2.f32 %v618_v48 }
 0x265   : > { %v1208_v49 = vpop.eup %1207 }
 0x266   : > { %v620_v50 = vsel %vm613_vm4, %v1208_v49, 0.0 }
 0x267   : > { %621 = vadd.xlane.f32.xlu1 %v620_v50 }
 0x29c   : > { %v797_v51 = vpop.permute.xlu1 %796 }
 0x29d   : > { %v799_v52 = vmul.f32 %v1204_v42, %v797_v51 }
 0x29f   : > { %801 = vrot.lane.b32.xlu0 %v799_v52, %s1486_s28 }
 0x2f4   : > { %v622_v53 = vpop.xlane.xlu1 %621 }
 0x2f5   : > { %1209 = vlog2.f32 %v622_v53 }
 0x2ff   : > { %v1210_v54 = vpop.eup %1209 }
 0x300   : > { %v624_v55 = vmul.f32 0.6931472, %v1210_v54 }
 0x302   : > { %v625_v56 = vadd.f32 %v624_v55, %v616_v46 }
 0x304   : > { %v626_v57 = vsub.f32 %v612_v37, %v625_v56 }
 0x306   : > { %627 = vst [vmem:[%s1798_s2] sm:$0x3] %v626_v57 }
 0x307   : > { %1366 = shalt.err (!%p1363_p3)
}
 0x308   : > { %s1367_s3 = scalar_lea.hbm %s1827_s8, 32  ;;  %s1371_s24 = scalar_lea.hbm %s1939_s26, 256 }
 0x309   : > { %p1368_p11 = scmp.ne.s32.totalorder %s1827_s8, %s1367_s3  ;;  %p1372_p8 = scmp.lt.u32.totalorder %s1827_s8, %s1939_s26 }
 0x30a   : > { %p1373_p5 = scmp.lt.u32.totalorder %s1371_s24, %s1367_s3  ;;  %p1375_p2 = scmp.lt.u32.totalorder %s1367_s3, %s1827_s8 }
 0x30b   : > { %p1369_p13 = pnand %p1368_p11, %p1940_p10 }
 0x30c   : > { %p1374_p4 = por %p1373_p5, %p1372_p8 }
 0x30d   : > { %p1370_p0 = pneg %p1369_p13 }
 0x30e   : > { %p1376_p1 = por %p1375_p2, %p1374_p4 }
 0x310   : > { %p1377_p12 = pnand %p1376_p1, %p1370_p0 }
 0x312   : > { %1380 = shalt.err (!%p1377_p12)
}
 0x313   : > { %1100 = dma.vmem_to_hbm [thread:$0]  (%p1940_p10), %s1829_s7, 32, %s1827_s8, %s807_s16   ;;  %vm804_vm5 = vcmask 254976   ;;  %v802_v58 = vpop.permute.xlu0 %801 }
 0x314   : > { %s1488_s17 = smov [#allocation12]   ;;  %805 = vst.msk [vmem:[#allocation12] sm:$0x3] %vm804_vm5, %v802_v58  ;;  %p1941_p9 = scmp.ne.s32.totalorder %s1930_s15, 0 }
 0x315   : > { %s834_s29 = sshll.u32 %s1488_s17, 4  ;;  %s835_s29 = int_to_ptr.vmem [resolvable:$true] %s834_s29 }
 0x316   : > { %s1381_s27 = scalar_lea.vmem %s835_s29, 32  ;;  %p1388_p11 = scmp.lt.s32.totalorder %s835_s29, %s835_s29 }
 0x317   : > { %p1382_p6 = scmp.ne.s32.totalorder %s835_s29, %s1381_s27  ;;  %p1389_p13 = scmp.lt.s32.totalorder %s1381_s27, %s1381_s27 }
 0x319   : > { %p1383_p7 = pnand %p1382_p6, %p1941_p9  ;;  %p1390_p0 = por %p1389_p13, %p1388_p11 }
 0x31b   : > { %p1384_p3 = pneg %p1383_p7 }
 0x31d   : > { %p1391_p8 = pnand %p1390_p0, %p1384_p3 }
 0x31f   : > { %1394 = shalt.err (!%p1391_p8)
}
 0x320   : > { %s1942_s19 = sld [smem:[#allocation23_spill]] }
 0x326   : > { %s1395_s7 = scalar_lea.hbm %s1942_s19, 32 }
 0x327   : > { %p1396_p10 = scmp.ne.s32.totalorder %s1942_s19, %s1395_s7  ;;  %p1401_p2 = scmp.lt.u32.totalorder %s1395_s7, %s1942_s19 }
 0x329   : > { %p1397_p5 = pnand %p1396_p10, %p1941_p9 }
 0x32b   : > { %p1398_p4 = pneg %p1397_p5 }
 0x32d   : > { %p1403_p1 = pnand %p1401_p2, %p1398_p4 }
 0x32f   : > { %1406 = shalt.err (!%p1403_p1)
}
 0x330   : > { %1102 = dma.vmem_to_hbm [thread:$0]  (%p1941_p9), %s835_s29, 32, %s1942_s19, [#allocation13]  }
 0x331   : > { %1444 = dma.done.wait (%p1941_p9), [#allocation13], 32  }
 0x332   : > { %1446 = vsyncadd (%p1941_p9), [#allocation13], 4294967264 }
 0x333 PF: > { %p1138_p12 = scmp.ge.s32.totalorder %s1473_s14, 2  ;;  %s850_s24 = sand.u32 1, %s1453_s30  }
 0x334   : > { %p1943_p6 = scmp.ne.s32.totalorder %s1934_s25, 0  ;;  %s851_s28 = scalar_lea.sflag [#allocation4], %s850_s24 }
 0x336   : > { %p1124_p7 = pnand %p1138_p12, %p1943_p6 }
 0x338   : > { %1448 = dma.done.wait (!%p1124_p7), %s851_s28, 32  }
 0x339   : > { %1450 = vsyncadd (!%p1124_p7), %s851_s28, 4294967264  ;;  %s29_s14 = sadd.s32 1, %s1473_s14   ;;  %s1944_s30 = smov %s1457_s10 }
 0x33a   : > { %p26_p3 = scmp.ge.s32.totalorder %s29_s14, 10   ;;  %s1945_s10 = smov %s1461_s11 }
 0x33b   : > { %s1946_s11 = smov %s1730_s23  ;;  %s1947_s12 = smov %s1469_s13 }
 0x33c   : > { %s1948_s13 = smov %s1950_s18  ;;  %28 = sbr.rel (!%p26_p3) target bundleno = 15 (0xf), region = 129 }
 0x343   :  { %856 = vsyncpa [#allocation3], 1 }
 0x344   :  { %858 = vsyncpa [#allocation3 + $0x1], 1 }
 0x345   :  { %859 = vsyncpa [#allocation6], 1 }
 0x346   :  { %860 = vsyncpa [#allocation9], 1 }
 0x347   :  { %861 = vsyncpa [#allocation4], 1 }
 0x348   :  { %863 = vsyncpa [#allocation4 + $0x1], 1 }
 0x349   :  { %864 = vsyncpa [#allocation13], 1 }

</bundles_post_ra>
